<compile_context>
chip_gen: v5e
topology: v5e:2x2
jax: 0.10.0
libtpu: 0.0.40
codegen_flags: <defaults>
</compile_context>

<pallas_src>
import functools

import jax
import jax.numpy as jnp
import numpy as np
from jax.experimental import pallas as pl
from jax.experimental.pallas import tpu as pltpu

LP = 128  # lane padding: all activations live in (B, 128) vreg-aligned slabs


def policy_rollout_kernel(obs_ref, mask_ref, h0_ref,
                          w_enc_ref, w_i_ref, w_h_ref, w_heads_ref,
                          out_ref, h_ref, *, H):
  """One env step per grid iteration; h carried in VMEM scratch."""
  f32 = jnp.float32
  t = pl.program_id(0)

  @pl.when(t == 0)
  def _():
    h_ref[...] = h0_ref[...]            # load initial recurrent state once

  B = obs_ref.shape[0]
  # Lane H is the "ones lane" used to fold biases into the matmuls.
  ones_lane = jax.lax.broadcasted_iota(jnp.int32, (B, LP), 1) == H

  obs = obs_ref[...]                    # (B, LP); lane OBS holds 1.0 (b_enc fold)
  mask = mask_ref[...]                  # (B, 1)
  hm = h_ref[...] * mask                # masked recurrent state; pad lanes stay 0
  h_in = jnp.where(ones_lane, 1.0, hm)  # ones lane -> b_h folded into w_h matmul

  # --- observation encoder (bias folded into w_enc via obs ones lane) ---
  feat = jnp.tanh(jnp.dot(obs, w_enc_ref[...], preferred_element_type=f32))
  feat = jnp.where(ones_lane, 1.0, feat)  # ones lane -> b_i folded into w_i matmul

  # --- GRU cell (PyTorch nn.GRUCell semantics), fused + vreg-aligned gates ---
  gi = jnp.dot(feat, w_i_ref[...], preferred_element_type=f32)   # (B, 3*LP)
  gh = jnp.dot(h_in, w_h_ref[...], preferred_element_type=f32)   # (B, 3*LP)

  r = jax.nn.sigmoid(gi[:, 0:LP] + gh[:, 0:LP])                  # full-vreg slabs
  z = jax.nn.sigmoid(gi[:, LP:2 * LP] + gh[:, LP:2 * LP])
  n = jnp.tanh(gi[:, 2 * LP:3 * LP] + r * gh[:, 2 * LP:3 * LP])
  h_new = (1.0 - z) * n + z * hm                                 # actor features

  # --- fused critic + DiagGaussian-mean head (+ logp constant column) ---
  h_aug = jnp.where(ones_lane, 1.0, h_new)
  heads = jnp.dot(h_aug, w_heads_ref[...], preferred_element_type=f32)  # (B, LP)

  # carry hidden state; one unmasked lane-dense store of the packed result
  h_ref[...] = h_new
  out_ref[...] = jnp.concatenate([h_new, heads], axis=1)          # (B, 2*LP)


def pack_params(p):
  """One-time host-side packing into 128-lane-aligned slabs with folded biases."""
  OBS, H = p["w_enc"].shape
  A = p["w_mu"].shape[1]
  assert H < LP and OBS < LP and (2 + A) <= LP

  # encoder: rows 0..OBS-1 = W_enc, row OBS = b_enc (obs ones lane)
  w_enc_p = jnp.zeros((LP, LP), jnp.float32)
  w_enc_p = w_enc_p.at[:OBS, :H].set(p["w_enc"])
  w_enc_p = w_enc_p.at[OBS, :H].set(p["b_enc"][0])

  def gate_block(w_r, w_z, w_n, b_r, b_z, b_n):
    w = jnp.zeros((LP, 3 * LP), jnp.float32)
    w = w.at[:H, 0:H].set(w_r)
    w = w.at[:H, LP:LP + H].set(w_z)
    w = w.at[:H, 2 * LP:2 * LP + H].set(w_n)
    w = w.at[H, 0:H].set(b_r[0])              # bias rows (activation ones lane)
    w = w.at[H, LP:LP + H].set(b_z[0])
    w = w.at[H, 2 * LP:2 * LP + H].set(b_n[0])
    return w

  w_i_p = gate_block(p["w_ir"], p["w_iz"], p["w_in"],
                     p["b_ir"], p["b_iz"], p["b_in"])
  w_h_p = gate_block(p["w_hr"], p["w_hz"], p["w_hn"],
                     p["b_hr"], p["b_hz"], p["b_hn"])

  # heads: col 0 = value, cols 1..A = mean, col 1+A = logp-at-mode constant.
  # NOTE: logp constant is only valid in deterministic mode; re-pack if logstd
  # is updated during training.
  logp_const = -jnp.sum(p["logstd"]) - 0.5 * A * jnp.log(2.0 * jnp.pi)
  w_heads_p = jnp.zeros((LP, LP), jnp.float32)
  w_heads_p = w_heads_p.at[:H, 0:1].set(p["w_v"])
  w_heads_p = w_heads_p.at[:H, 1:1 + A].set(p["w_mu"])
  w_heads_p = w_heads_p.at[H, 0].set(p["b_v"][0, 0])
  w_heads_p = w_heads_p.at[H, 1:1 + A].set(p["b_mu"][0])
  w_heads_p = w_heads_p.at[H, 1 + A].set(logp_const)

  return {"w_enc": w_enc_p, "w_i": w_i_p, "w_h": w_h_p, "w_heads": w_heads_p}


def make_policy_rollout(H, A, OBS):
  """Fused T-step rollout: one pallas_call, weights resident across steps."""
  kernel = functools.partial(policy_rollout_kernel, H=H)

  @jax.jit
  def rollout(obs, masks, rnn_hxs, packed):
    T, B = obs.shape[0], obs.shape[1]
    # Pad obs to 128 lanes with a ones column at lane OBS (encoder-bias fold);
    # pad the initial hidden state to 128 lanes with zeros.
    obs_p = jnp.concatenate(
        [obs, jnp.ones((T, B, 1), jnp.float32),
         jnp.zeros((T, B, LP - OBS - 1), jnp.float32)], axis=-1)
    h0_p = jnp.concatenate(
        [rnn_hxs, jnp.zeros((B, LP - H), jnp.float32)], axis=-1)

    out = pl.pallas_call(
        kernel,
        grid=(T,),
        in_specs=[
            pl.BlockSpec((None, B, LP), lambda t: (t, 0, 0)),    # obs (per step)
            pl.BlockSpec((None, B, 1), lambda t: (t, 0, 0)),     # masks (per step)
            pl.BlockSpec((B, LP), lambda t: (0, 0)),             # h0 (resident)
            pl.BlockSpec((LP, LP), lambda t: (0, 0)),            # w_enc (resident)
            pl.BlockSpec((LP, 3 * LP), lambda t: (0, 0)),        # w_i (resident)
            pl.BlockSpec((LP, 3 * LP), lambda t: (0, 0)),        # w_h (resident)
            pl.BlockSpec((LP, LP), lambda t: (0, 0)),            # w_heads (resident)
        ],
        out_specs=pl.BlockSpec((None, B, 2 * LP), lambda t: (t, 0, 0)),
        out_shape=jax.ShapeDtypeStruct((T, B, 2 * LP), jnp.float32),
        scratch_shapes=[pltpu.VMEM((B, LP), jnp.float32)],       # carried h
        # Time axis carries the GRU state -> must be "arbitrary", not parallel.
        # TODO(synk): once env batch B is scaled up, add a parallel batch grid
        # axis so v7x's 2 TensorCores split the work.
        compiler_params=pltpu.CompilerParams(
            dimension_semantics=("arbitrary",)),
    )(obs_p, masks, h0_p,
      packed["w_enc"], packed["w_i"], packed["w_h"], packed["w_heads"])

    # unpack the lane-dense output slab [h(128) | value, action, logp, pad]
    h_seq = out[:, :, 0:H]
    value = out[:, :, LP:LP + 1]
    action = out[:, :, LP + 1:LP + 1 + A]
    logp = out[:, :, LP + 1 + A:LP + 2 + A]
    return value, action, logp, h_seq

  return rollout


def make_policy_act(H, A, OBS):
  """Single-step Policy.act() equivalent (deterministic mode only)."""
  rollout = make_policy_rollout(H, A, OBS)

  def act(obs, rnn_hxs, masks, packed, deterministic=True):
    if not deterministic:
      # TODO(synk): stochastic dist.sample() not implemented (mode only).
      raise NotImplementedError("only deterministic (mode) action supported")
    value, action, logp, h_seq = rollout(obs[None], masks[None], rnn_hxs, packed)
    return value[0], action[0], logp[0], h_seq[0]

  return act


# ------------------------- pure-JAX reference ---------------------------------


def reference_act(obs, rnn_hxs, masks, p):
  h = rnn_hxs * masks
  feat = jnp.tanh(obs @ p["w_enc"] + p["b_enc"])
  r = jax.nn.sigmoid(feat @ p["w_ir"] + p["b_ir"] + h @ p["w_hr"] + p["b_hr"])
  z = jax.nn.sigmoid(feat @ p["w_iz"] + p["b_iz"] + h @ p["w_hz"] + p["b_hz"])
  n = jnp.tanh(feat @ p["w_in"] + p["b_in"] + r * (h @ p["w_hn"] + p["b_hn"]))
  h_new = (1.0 - z) * n + z * h
  value = h_new @ p["w_v"] + p["b_v"]
  mean = h_new @ p["w_mu"] + p["b_mu"]
  action = mean
  logstd = p["logstd"]
  var = jnp.exp(2.0 * logstd)
  logp = (-((action - mean) ** 2) / (2.0 * var)
          - logstd - 0.5 * jnp.log(2.0 * jnp.pi))
  return value, action, jnp.sum(logp, axis=-1, keepdims=True), h_new


@jax.jit
def reference_rollout(obs_seq, masks_seq, rnn_hxs, p):
  def step(h, inp):
    obs_t, mask_t = inp
    v, a, lp, h_new = reference_act(obs_t, h, mask_t, p)
    return h_new, (v, a, lp, h_new)

  _, (vs, acts, lps, hs) = jax.lax.scan(step, rnn_hxs, (obs_seq, masks_seq))
  return vs, acts, lps, hs


def make_params(key, obs_dim, hidden, num_actions):
  ks = jax.random.split(key, 16)
  s = 0.1
  return {
      "w_enc": s * jax.random.normal(ks[0], (obs_dim, hidden), jnp.float32),
      "b_enc": jnp.zeros((1, hidden), jnp.float32),
      "w_ir": s * jax.random.normal(ks[1], (hidden, hidden), jnp.float32),
      "w_iz": s * jax.random.normal(ks[2], (hidden, hidden), jnp.float32),
      "w_in": s * jax.random.normal(ks[3], (hidden, hidden), jnp.float32),
      "b_ir": jnp.zeros((1, hidden), jnp.float32),
      "b_iz": jnp.zeros((1, hidden), jnp.float32),
      "b_in": jnp.zeros((1, hidden), jnp.float32),
      "w_hr": s * jax.random.normal(ks[4], (hidden, hidden), jnp.float32),
      "w_hz": s * jax.random.normal(ks[5], (hidden, hidden), jnp.float32),
      "w_hn": s * jax.random.normal(ks[6], (hidden, hidden), jnp.float32),
      "b_hr": jnp.zeros((1, hidden), jnp.float32),
      "b_hz": jnp.zeros((1, hidden), jnp.float32),
      "b_hn": jnp.zeros((1, hidden), jnp.float32),
      "w_v": s * jax.random.normal(ks[7], (hidden, 1), jnp.float32),
      "b_v": jnp.zeros((1, 1), jnp.float32),
      "w_mu": s * jax.random.normal(ks[8], (hidden, num_actions), jnp.float32),
      "b_mu": jnp.zeros((1, num_actions), jnp.float32),
      # AddBias logstd, initialized to zeros like DiagGaussian
      "logstd": jnp.zeros((1, num_actions), jnp.float32),
  }


if __name__ == "__main__":
  # rollout length, batch, obs dim, recurrent hidden, Box action dim
  T, B, OBS, H, A = 8, 8, 32, 32, 2

  key = jax.random.PRNGKey(0)
  k_obs, k_h, k_p = jax.random.split(key, 3)
  obs_seq = jax.random.normal(k_obs, (T, B, OBS), jnp.float32)
  rnn_hxs = jax.random.normal(k_h, (B, H), jnp.float32)
  masks_seq = jnp.ones((T, B, 1), jnp.float32)
  # exercise episode-reset masking mid-rollout for half the batch
  masks_seq = masks_seq.at[4, :B // 2, 0].set(0.0)

  params = make_params(k_p, OBS, H, A)
  packed = pack_params(params)          # pack ONCE per parameter update

  rollout = make_policy_rollout(H, A, OBS)
  value, action, logp, h_seq = rollout(obs_seq, masks_seq, rnn_hxs, packed)
  jax.block_until_ready((value, action, logp, h_seq))

  rv, ra, rl, rh = reference_rollout(obs_seq, masks_seq, rnn_hxs, params)
  np.testing.assert_allclose(np.asarray(value), np.asarray(rv), rtol=1e-4, atol=1e-4)
  np.testing.assert_allclose(np.asarray(action), np.asarray(ra), rtol=1e-4, atol=1e-4)
  np.testing.assert_allclose(np.asarray(logp), np.asarray(rl), rtol=1e-4, atol=1e-4)
  np.testing.assert_allclose(np.asarray(h_seq), np.asarray(rh), rtol=1e-4, atol=1e-4)

  # single-step Policy.act(deterministic=True) parity
  act = make_policy_act(H, A, OBS)
  v1, a1, lp1, h1 = act(obs_seq[0], rnn_hxs, masks_seq[0], packed)
  jax.block_until_ready((v1, a1, lp1, h1))
  np.testing.assert_allclose(np.asarray(v1), np.asarray(rv[0]), rtol=1e-4, atol=1e-4)
  np.testing.assert_allclose(np.asarray(a1), np.asarray(ra[0]), rtol=1e-4, atol=1e-4)
  np.testing.assert_allclose(np.asarray(h1), np.asarray(rh[0]), rtol=1e-4, atol=1e-4)

  print("KERNEL_OK")
</pallas_src>

<mosaic_0001>
module attributes {stable_mosaic.version = 11 : i64} {
  func.func @policy_rollout_kernel(%arg0: i32, %arg1: memref<1x8x128xf32, #tpu.memory_space<vmem>>, %arg2: memref<1x8x1xf32, #tpu.memory_space<vmem>>, %arg3: memref<8x128xf32, #tpu.memory_space<vmem>>, %arg4: memref<128x128xf32, #tpu.memory_space<vmem>>, %arg5: memref<128x384xf32, #tpu.memory_space<vmem>>, %arg6: memref<128x384xf32, #tpu.memory_space<vmem>>, %arg7: memref<128x128xf32, #tpu.memory_space<vmem>>, %arg8: memref<1x8x256xf32, #tpu.memory_space<vmem>>, %arg9: memref<8x128xf32, #tpu.memory_space<vmem>>) attributes {dimension_semantics = [#tpu.dimension_semantics<arbitrary>], iteration_bounds = array<i64: 8>, scalar_prefetch = 0 : i64, scratch_operands = 1 : i64, tpu.core_type = #tpu.core_type<tc>, window_params = [{transform_indices = @transform_0, window_bounds = array<i64: 1, 8, 128>}, {transform_indices = @transform_1, window_bounds = array<i64: 1, 8, 1>}, {pipeline_mode = #tpu.pipeline_mode<synchronous>, transform_indices = @transform_2, window_bounds = array<i64: 8, 128>}, {pipeline_mode = #tpu.pipeline_mode<synchronous>, transform_indices = @transform_3, window_bounds = array<i64: 128, 128>}, {pipeline_mode = #tpu.pipeline_mode<synchronous>, transform_indices = @transform_4, window_bounds = array<i64: 128, 384>}, {pipeline_mode = #tpu.pipeline_mode<synchronous>, transform_indices = @transform_5, window_bounds = array<i64: 128, 384>}, {pipeline_mode = #tpu.pipeline_mode<synchronous>, transform_indices = @transform_6, window_bounds = array<i64: 128, 128>}, {transform_indices = @transform_7, window_bounds = array<i64: 1, 8, 256>}]} {
    %c0_i32 = arith.constant 0 : i32
    %0 = arith.cmpi eq, %arg0, %c0_i32 : i32
    %1 = arith.extui %0 : i1 to i32
    %c0_i32_0 = arith.constant 0 : i32
    %2 = arith.cmpi ne, %1, %c0_i32_0 : i32
    scf.if %2 {
      %c0_30 = arith.constant 0 : index
      %c0_31 = arith.constant 0 : index
      %59 = vector.load %arg3[%c0_30, %c0_31] : memref<8x128xf32, #tpu.memory_space<vmem>>, vector<8x128xf32>
      %c0_32 = arith.constant 0 : index
      %c0_33 = arith.constant 0 : index
      %60 = vector.load %arg9[%c0_32, %c0_33] : memref<8x128xf32, #tpu.memory_space<vmem>>, vector<8x128xf32>
      tpu.vector_store %arg9[%c0_32, %c0_33], %59 {strides = array<i32>} : memref<8x128xf32, #tpu.memory_space<vmem>>, vector<8x128xf32>,
    } else {
    }
    %3 = tpu.iota {dimensions = array<i32: 1>} : vector<8x128xi32>
    %c32_i32 = arith.constant 32 : i32
    %4 = vector.broadcast %c32_i32 : i32 to vector<8x128xi32>
    %5 = arith.cmpi eq, %3, %4 : vector<8x128xi32>
    %c0 = arith.constant 0 : index
    %c0_1 = arith.constant 0 : index
    %c0_2 = arith.constant 0 : index
    %6 = vector.load %arg1[%c0, %c0_1, %c0_2] : memref<1x8x128xf32, #tpu.memory_space<vmem>>, vector<1x8x128xf32>
    %7 = vector.shape_cast %6 : vector<1x8x128xf32> to vector<8x128xf32>
    %c0_3 = arith.constant 0 : index
    %c0_4 = arith.constant 0 : index
    %c0_5 = arith.constant 0 : index
    %8 = vector.load %arg2[%c0_3, %c0_4, %c0_5] : memref<1x8x1xf32, #tpu.memory_space<vmem>>, vector<1x8x1xf32>
    %9 = vector.shape_cast %8 : vector<1x8x1xf32> to vector<8x1xf32>
    %c0_6 = arith.constant 0 : index
    %c0_7 = arith.constant 0 : index
    %10 = vector.load %arg9[%c0_6, %c0_7] : memref<8x128xf32, #tpu.memory_space<vmem>>, vector<8x128xf32>
    %11 = vector.broadcast %9 : vector<8x1xf32> to vector<8x128xf32>
    %12 = arith.mulf %10, %11 : vector<8x128xf32>
    %cst = arith.constant 1.000000e+00 : f32
    %13 = vector.broadcast %cst : f32 to vector<8x128xf32>
    %14 = arith.select %5, %13, %12 : vector<8x128xi1>, vector<8x128xf32>
    %c0_8 = arith.constant 0 : index
    %c0_9 = arith.constant 0 : index
    %15 = vector.load %arg4[%c0_8, %c0_9] : memref<128x128xf32, #tpu.memory_space<vmem>>, vector<128x128xf32>
    %cst_10 = arith.constant dense<0.000000e+00> : vector<8x128xf32>
    %16 = tpu.matmul %7, %15, %cst_10 {dimension_numbers = #tpu.dot_dimension_numbers<[1], [0], [0], [1], [0, 0, 1, 1], [], []>} : vector<8x128xf32>, vector<128x128xf32>, vector<8x128xf32> -> vector<8x128xf32>
    %17 = math.tanh %16 : vector<8x128xf32>
    %cst_11 = arith.constant 1.000000e+00 : f32
    %18 = vector.broadcast %cst_11 : f32 to vector<8x128xf32>
    %19 = arith.select %5, %18, %17 : vector<8x128xi1>, vector<8x128xf32>
    %c0_12 = arith.constant 0 : index
    %c0_13 = arith.constant 0 : index
    %20 = vector.load %arg5[%c0_12, %c0_13] : memref<128x384xf32, #tpu.memory_space<vmem>>, vector<128x384xf32>
    %cst_14 = arith.constant dense<0.000000e+00> : vector<8x384xf32>
    %21 = tpu.matmul %19, %20, %cst_14 {dimension_numbers = #tpu.dot_dimension_numbers<[1], [0], [0], [1], [0, 0, 1, 1], [], []>} : vector<8x128xf32>, vector<128x384xf32>, vector<8x384xf32> -> vector<8x384xf32>
    %c0_15 = arith.constant 0 : index
    %c0_16 = arith.constant 0 : index
    %22 = vector.load %arg6[%c0_15, %c0_16] : memref<128x384xf32, #tpu.memory_space<vmem>>, vector<128x384xf32>
    %cst_17 = arith.constant dense<0.000000e+00> : vector<8x384xf32>
    %23 = tpu.matmul %14, %22, %cst_17 {dimension_numbers = #tpu.dot_dimension_numbers<[1], [0], [0], [1], [0, 0, 1, 1], [], []>} : vector<8x128xf32>, vector<128x384xf32>, vector<8x384xf32> -> vector<8x384xf32>
    %24 = vector.extract_strided_slice %21 {offsets = [0, 0], sizes = [8, 128], strides = [1, 1]} : vector<8x384xf32> to vector<8x128xf32>
    %25 = vector.extract_strided_slice %23 {offsets = [0, 0], sizes = [8, 128], strides = [1, 1]} : vector<8x384xf32> to vector<8x128xf32>
    %26 = arith.addf %24, %25 : vector<8x128xf32>
    %27 = arith.negf %26 : vector<8x128xf32>
    %28 = math.exp %27 : vector<8x128xf32>
    %cst_18 = arith.constant 1.000000e+00 : f32
    %29 = vector.broadcast %cst_18 : f32 to vector<8x128xf32>
    %30 = arith.addf %29, %28 : vector<8x128xf32>
    %31 = arith.divf %29, %30 : vector<8x128xf32>
    %32 = vector.extract_strided_slice %21 {offsets = [0, 128], sizes = [8, 128], strides = [1, 1]} : vector<8x384xf32> to vector<8x128xf32>
    %33 = vector.extract_strided_slice %23 {offsets = [0, 128], sizes = [8, 128], strides = [1, 1]} : vector<8x384xf32> to vector<8x128xf32>
    %34 = arith.addf %32, %33 : vector<8x128xf32>
    %35 = arith.negf %34 : vector<8x128xf32>
    %36 = math.exp %35 : vector<8x128xf32>
    %cst_19 = arith.constant 1.000000e+00 : f32
    %37 = vector.broadcast %cst_19 : f32 to vector<8x128xf32>
    %38 = arith.addf %37, %36 : vector<8x128xf32>
    %39 = arith.divf %37, %38 : vector<8x128xf32>
    %40 = vector.extract_strided_slice %21 {offsets = [0, 256], sizes = [8, 128], strides = [1, 1]} : vector<8x384xf32> to vector<8x128xf32>
    %41 = vector.extract_strided_slice %23 {offsets = [0, 256], sizes = [8, 128], strides = [1, 1]} : vector<8x384xf32> to vector<8x128xf32>
    %42 = arith.mulf %31, %41 : vector<8x128xf32>
    %43 = arith.addf %40, %42 : vector<8x128xf32>
    %44 = math.tanh %43 : vector<8x128xf32>
    %cst_20 = arith.constant 1.000000e+00 : f32
    %45 = vector.broadcast %cst_20 : f32 to vector<8x128xf32>
    %46 = arith.subf %45, %39 : vector<8x128xf32>
    %47 = arith.mulf %46, %44 : vector<8x128xf32>
    %48 = arith.mulf %39, %12 : vector<8x128xf32>
    %49 = arith.addf %47, %48 : vector<8x128xf32>
    %cst_21 = arith.constant 1.000000e+00 : f32
    %50 = vector.broadcast %cst_21 : f32 to vector<8x128xf32>
    %51 = arith.select %5, %50, %49 : vector<8x128xi1>, vector<8x128xf32>
    %c0_22 = arith.constant 0 : index
    %c0_23 = arith.constant 0 : index
    %52 = vector.load %arg7[%c0_22, %c0_23] : memref<128x128xf32, #tpu.memory_space<vmem>>, vector<128x128xf32>
    %cst_24 = arith.constant dense<0.000000e+00> : vector<8x128xf32>
    %53 = tpu.matmul %51, %52, %cst_24 {dimension_numbers = #tpu.dot_dimension_numbers<[1], [0], [0], [1], [0, 0, 1, 1], [], []>} : vector<8x128xf32>, vector<128x128xf32>, vector<8x128xf32> -> vector<8x128xf32>
    %c0_25 = arith.constant 0 : index
    %c0_26 = arith.constant 0 : index
    %54 = vector.load %arg9[%c0_25, %c0_26] : memref<8x128xf32, #tpu.memory_space<vmem>>, vector<8x128xf32>
    tpu.vector_store %arg9[%c0_25, %c0_26], %49 {strides = array<i32>} : memref<8x128xf32, #tpu.memory_space<vmem>>, vector<8x128xf32>,
    %55 = tpu.concatenate %49, %53 in 1 : vector<8x128xf32>, vector<8x128xf32> -> vector<8x256xf32>
    %c0_27 = arith.constant 0 : index
    %c0_28 = arith.constant 0 : index
    %c0_29 = arith.constant 0 : index
    %56 = vector.load %arg8[%c0_27, %c0_28, %c0_29] : memref<1x8x256xf32, #tpu.memory_space<vmem>>, vector<1x8x256xf32>
    %57 = vector.shape_cast %56 : vector<1x8x256xf32> to vector<8x256xf32>
    %58 = vector.shape_cast %55 : vector<8x256xf32> to vector<1x8x256xf32>
    tpu.vector_store %arg8[%c0_27, %c0_28, %c0_29], %58 {strides = array<i32>} : memref<1x8x256xf32, #tpu.memory_space<vmem>>, vector<1x8x256xf32>,
    return
  }
  func.func @transform_0(%arg0: i32) -> (i32, i32, i32) {
    %c0_i32 = arith.constant 0 : i32
    %c0_i32_0 = arith.constant 0 : i32
    %c0_i32_1 = arith.constant 0 : i32
    return %arg0, %c0_i32, %c0_i32_0 : i32, i32, i32
  }
  func.func @transform_1(%arg0: i32) -> (i32, i32, i32) {
    %c0_i32 = arith.constant 0 : i32
    %c0_i32_0 = arith.constant 0 : i32
    %c0_i32_1 = arith.constant 0 : i32
    return %arg0, %c0_i32, %c0_i32_0 : i32, i32, i32
  }
  func.func @transform_2(%arg0: i32) -> (i32, i32) {
    %c0_i32 = arith.constant 0 : i32
    %c0_i32_0 = arith.constant 0 : i32
    %c0_i32_1 = arith.constant 0 : i32
    return %c0_i32, %c0_i32_0 : i32, i32
  }
  func.func @transform_3(%arg0: i32) -> (i32, i32) {
    %c0_i32 = arith.constant 0 : i32
    %c0_i32_0 = arith.constant 0 : i32
    %c0_i32_1 = arith.constant 0 : i32
    return %c0_i32, %c0_i32_0 : i32, i32
  }
  func.func @transform_4(%arg0: i32) -> (i32, i32) {
    %c0_i32 = arith.constant 0 : i32
    %c0_i32_0 = arith.constant 0 : i32
    %c0_i32_1 = arith.constant 0 : i32
    return %c0_i32, %c0_i32_0 : i32, i32
  }
  func.func @transform_5(%arg0: i32) -> (i32, i32) {
    %c0_i32 = arith.constant 0 : i32
    %c0_i32_0 = arith.constant 0 : i32
    %c0_i32_1 = arith.constant 0 : i32
    return %c0_i32, %c0_i32_0 : i32, i32
  }
  func.func @transform_6(%arg0: i32) -> (i32, i32) {
    %c0_i32 = arith.constant 0 : i32
    %c0_i32_0 = arith.constant 0 : i32
    %c0_i32_1 = arith.constant 0 : i32
    return %c0_i32, %c0_i32_0 : i32, i32
  }
  func.func @transform_7(%arg0: i32) -> (i32, i32, i32) {
    %c0_i32 = arith.constant 0 : i32
    %c0_i32_0 = arith.constant 0 : i32
    %c0_i32_1 = arith.constant 0 : i32
    return %arg0, %c0_i32, %c0_i32_0 : i32, i32, i32
  }
}

</mosaic_0001>

<bundles_post_ra>
// kernel: rollout.1
= control target key start
LH: loop header
LB: loop body
LE: loop exit
PB: predicated region body
PF: predicated region fallthrough
CT: control target
= control target key end

     0   :  { %12 = vsyncpa [#allocation4], 0  ;;  %s1169_s0 = inlined_call_operand.vmem [shape: f32[8,8,128], index: 0, kind: input, shape index: {}]   ;;  %s1170_s1 = inlined_call_operand.vmem [shape: f32[8,8,1], index: 1, kind: input, shape index: {}]   ;;  %s1171_s2 = inlined_call_operand.vmem [shape: f32[8,128], index: 2, kind: input, shape index: {}]   ;;  %s1172_s3 = inlined_call_operand.vmem [shape: f32[128,128], index: 3, kind: input, shape index: {}]   ;;  %s1173_s4 = inlined_call_operand.hbm [shape: f32[128,384], index: 4, kind: input, shape index: {}]   ;;  %s1174_s5 = inlined_call_operand.hbm [shape: f32[128,384], index: 5, kind: input, shape index: {}]   ;;  %s1175_s6 = inlined_call_operand.hbm [shape: f32[128,128], index: 6, kind: input, shape index: {}]   ;;  %s1176_s7 = inlined_call_operand.vmem [shape: f32[8,8,256], index: 7, kind: output, shape index: {}]  }
   0x1   :  { %13 = vsyncpa [#allocation6], 0  ;;  %s1033_s24 = smov 0  }
   0x2 LB: > { %s1039_s25 = sadd.s32 4294967295, %s983_s24   ;;  %p803_p0 = scmp.ge.s32.totalorder %s983_s24, 1  ;;  %s983_s24 = sphi %s1033_s24, %s19_s24  }
   0x3   : > { %p207_p1 = scmp.lt.s32.totalorder %s983_s24, 9  ;;  %p804_p2 = scmp.ne.s32.totalorder %s1039_s25, 0 }
   0x4   : > { %p844_p3 = scmp.eq.s32.totalorder %s1039_s25, 0  ;;  %s238_s28 = sshll.u32 %s1174_s5, 4  ;;  %s239_s28 = int_to_ptr.hbm [resolvable:$true] %s238_s28 }
   0x5   : > { %p1048_p4 = pnand %p803_p0, %p207_p1  ;;  %s224_s9 = sshll.u32 %s1173_s4, 4  ;;  %s225_s9 = int_to_ptr.hbm [resolvable:$true] %s224_s9 }
   0x6   : > { %s985_s10 = smov [#allocation5]   ;;  %s986_s13 = smov [#allocation3]  }
   0x7   : > { %p834_p5 = pneg %p1048_p4  ;;  %s240_s11 = sshll.u32 %s985_s10, 4  ;;  %s241_s11 = int_to_ptr.vmem [resolvable:$true] %s240_s11 }
   0x8   : > { %s226_s14 = sshll.u32 %s986_s13, 4  ;;  %s252_s17 = sshll.u32 %s1175_s6, 4  ;;  %s227_s14 = int_to_ptr.vmem [resolvable:$true] %s226_s14  ;;  %s253_s17 = int_to_ptr.hbm [resolvable:$true] %s252_s17 }
   0x9   : > { %p1059_p6 = pnand %p844_p3, %p834_p5  ;;  %s987_s18 = smov 384  }
   0xa   : > { %s988_s19 = smov 24   ;;  %s989_s20 = smov [#allocation7]  }
   0xb   : > { %840 = dma.hbm_to_vmem [thread:$0]  (!%p1059_p6), %s239_s28, 6144, %s241_s11, [#allocation6], %s987_s18, %s987_s18, %s988_s19  }
   0xc   : > { %837 = dma.hbm_to_vmem [thread:$0]  (!%p1059_p6), %s225_s9, 6144, %s227_s14, [#allocation4], %s987_s18, %s987_s18, %s988_s19  }
   0xd   : > { %s254_s21 = sshll.u32 %s989_s20, 4  ;;  %s990_s22 = smov 128   ;;  %s255_s21 = int_to_ptr.vmem [resolvable:$true] %s254_s21 }
   0xe   : > { %s991_s23 = smov 8   ;;  %284 = sbr.rel (%p1048_p4) target bundleno = 503 (0x1f7), region = 48 }
   0xf   : > { %843 = dma.hbm_to_vmem [thread:$0]  (!%p1059_p6), %s253_s17, 2048, %s255_s21, [#allocation6], %s990_s22, %s990_s22, %s991_s23  }
  0x13   : > { %974 = dma.done.wait (%p844_p3), [#allocation4], 6144  }
  0x14   : > { %976 = vsyncadd (%p844_p3), [#allocation4], 4294961152 }
  0x15   : > { %978 = dma.done.wait (%p844_p3), [#allocation6], 8192  }
  0x16   : > { %980 = vsyncadd (%p844_p3), [#allocation6], 4294959104  ;;  %p330_p7 = scmp.lt.s32.totalorder %s1039_s25, 7 }
  0x18   : > { %s331_s26 = scalar_select %p330_p7, %s1039_s25, 7 }
  0x19   : > { %346 = sbr.rel (%p804_p2) target bundleno = 32 (0x20), region = 64 }
  0x1a   : > { %s812_s27 = sshll.u32 %s331_s26, 3  ;;  %s821_s28 = sshll.u32 %s331_s26, 4 }
  0x1b   : > { %s1087_s8 = scalar_lea.vmem %s1169_s0, %s812_s27  ;;  %s337_s11 = scalar_lea.vmem %s1170_s1, %s812_s27 }
  0x1c   : > { %s1095_s14 = scalar_lea.vmem %s1176_s7, %s821_s28 }
  0x1e   : > { %v347_v0 = vld [vmem:[%s1171_s2] sm:$0xff] }
  0x1f   : > { %348 = vst [vmem:[#allocation2] sm:$0xff] %v347_v0 }
  0x20 PF: > { %v377_v1 = vld [vmem:[%s1172_s3 + $0x78] sm:$0xff]  ;;  %v376_v2 = vld [vmem:[%s1172_s3 + $0x70] sm:$0xff]  ;;  %v992_v3 = vmov 0   ;;  %v375_v4 = vld [vmem:[%s1172_s3 + $0x68] sm:$0xff] }
  0x21   : > { %378 = vmatpush.msra.mxu0 %v377_v1  ;;  %866 = vset.pattern.permute.xlu0 %v992_v3  ;;  %v374_v5 = vld [vmem:[%s1172_s3 + $0x60] sm:$0xff]  ;;  %v373_v6 = vld [vmem:[%s1172_s3 + $0x58] sm:$0xff]  ;;  %v445_v8 = vld [vmem:[#allocation3 + $0x168] sm:$0xff] }
  0x22   : > { %v353_v7 = vld [vmem:[%s337_s11] sm:$0xff]  ;;  %v446_v9 = vld [vmem:[#allocation3 + $0x170] sm:$0xff]  ;;  %448 = vmatpush.msra.mxu1 %v445_v8  ;;  %v372_v12 = vld [vmem:[%s1172_s3 + $0x50] sm:$0xff] }
  0x23   : > { %379 = vmatpush.msra.mxu0 %v376_v2  ;;  %357 = vperm.xlu0 %866, %v353_v7   ;;  %v442_v10 = vld [vmem:[#allocation3 + $0x150] sm:$0xff]  ;;  %v443_v11 = vld [vmem:[#allocation3 + $0x158] sm:$0xff]  ;;  %v440_v14 = vld [vmem:[#allocation3 + $0x140] sm:$0xff] }
  0x24   : > { %468 = vmatpush.msra.mxu2 %v446_v9  ;;  %v439_v13 = vld [vmem:[#allocation3 + $0x138] sm:$0xff]  ;;  %449 = vmatpush.msra.mxu1 %v442_v10  ;;  %v371_v15 = vld [vmem:[%s1172_s3 + $0x48] sm:$0xff]  ;;  %v437_v17 = vld [vmem:[#allocation3 + $0x128] sm:$0xff] }
  0x25   : > { %380 = vmatpush.msra.mxu0 %v375_v4  ;;  %v436_v16 = vld [vmem:[#allocation3 + $0x120] sm:$0xff]  ;;  %v370_v18 = vld [vmem:[%s1172_s3 + $0x40] sm:$0xff]  ;;  %v433_v19 = vld [vmem:[#allocation3 + $0x108] sm:$0xff] }
  0x26   : > { %469 = vmatpush.msra.mxu2 %v443_v11  ;;  %450 = vmatpush.msra.mxu1 %v439_v13  ;;  %v434_v20 = vld [vmem:[#allocation3 + $0x110] sm:$0xff]  ;;  %v447_v23 = vld [vmem:[#allocation3 + $0x178] sm:$0xff]  ;;  %v444_v25 = vld [vmem:[#allocation3 + $0x160] sm:$0xff] }
  0x27   : > { %381 = vmatpush.msra.mxu0 %v374_v5  ;;  %v369_v21 = vld [vmem:[%s1172_s3 + $0x38] sm:$0xff]  ;;  %v431_v24 = vld [vmem:[#allocation3 + $0xf8] sm:$0xff]  ;;  %v368_v26 = vld [vmem:[%s1172_s3 + $0x30] sm:$0xff]  ;;  %488 = vmatpush.msra.mxu3 %v447_v23 }
  0x28   : > { %470 = vmatpush.msra.mxu2 %v440_v14  ;;  %451 = vmatpush.msra.mxu1 %v436_v16  ;;  %v430_v22 = vld [vmem:[#allocation3 + $0xf0] sm:$0xff]  ;;  %v427_v27 = vld [vmem:[#allocation3 + $0xd8] sm:$0xff]  ;;  %v428_v28 = vld [vmem:[#allocation3 + $0xe0] sm:$0xff] }
  0x29   : > { %382 = vmatpush.msra.mxu0 %v373_v6  ;;  %v441_v29 = vld [vmem:[#allocation3 + $0x148] sm:$0xff]  ;;  %v367_v30 = vld [vmem:[%s1172_s3 + $0x28] sm:$0xff]  ;;  %489 = vmatpush.msra.mxu3 %v444_v25  ;;  %v438_v33 = vld [vmem:[#allocation3 + $0x130] sm:$0xff] }
  0x2a   : > { %471 = vmatpush.msra.mxu2 %v437_v17  ;;  %452 = vmatpush.msra.mxu1 %v433_v19  ;;  %v424_v31 = vld [vmem:[#allocation3 + $0xc0] sm:$0xff]  ;;  %v425_v32 = vld [vmem:[#allocation3 + $0xc8] sm:$0xff]  ;;  %v366_v34 = vld [vmem:[%s1172_s3 + $0x20] sm:$0xff] }
  0x2b   : > { %383 = vmatpush.msra.mxu0 %v372_v12  ;;  %v421_v35 = vld [vmem:[#allocation3 + $0xa8] sm:$0xff]  ;;  %490 = vmatpush.msra.mxu3 %v441_v29  ;;  %v422_v36 = vld [vmem:[#allocation3 + $0xb0] sm:$0xff]  ;;  %v435_v37 = vld [vmem:[#allocation3 + $0x118] sm:$0xff] }
  0x2c   : > { %472 = vmatpush.msra.mxu2 %v434_v20  ;;  %453 = vmatpush.msra.mxu1 %v430_v22  ;;  %v365_v38 = vld [vmem:[%s1172_s3 + $0x18] sm:$0xff]  ;;  %v419_v40 = vld [vmem:[#allocation3 + $0x98] sm:$0xff]  ;;  %v432_v41 = vld [vmem:[#allocation3 + $0x100] sm:$0xff] }
  0x2d   : > { %384 = vmatpush.msra.mxu0 %v371_v15  ;;  %v418_v39 = vld [vmem:[#allocation3 + $0x90] sm:$0xff]  ;;  %491 = vmatpush.msra.mxu3 %v438_v33  ;;  %v364_v42 = vld [vmem:[%s1172_s3 + $0x10] sm:$0xff]  ;;  %v415_v43 = vld [vmem:[#allocation3 + $0x78] sm:$0xff] }
  0x2e   : > { %473 = vmatpush.msra.mxu2 %v431_v24  ;;  %454 = vmatpush.msra.mxu1 %v427_v27  ;;  %v416_v44 = vld [vmem:[#allocation3 + $0x80] sm:$0xff]  ;;  %v429_v45 = vld [vmem:[#allocation3 + $0xe8] sm:$0xff]  ;;  %v426_v49 = vld [vmem:[#allocation3 + $0xd0] sm:$0xff] }
  0x2f   : > { %385 = vmatpush.msra.mxu0 %v370_v18  ;;  %492 = vmatpush.msra.mxu3 %v435_v37  ;;  %v363_v46 = vld [vmem:[%s1172_s3 + $0x8] sm:$0xff]  ;;  %v413_v48 = vld [vmem:[#allocation3 + $0x68] sm:$0xff]  ;;  %v362_v50 = vld [vmem:[%s1172_s3] sm:$0xff] }
  0x30   : > { %474 = vmatpush.msra.mxu2 %v428_v28  ;;  %455 = vmatpush.msra.mxu1 %v424_v31  ;;  %v412_v47 = vld [vmem:[#allocation3 + $0x60] sm:$0xff]  ;;  %v409_v51 = vld [vmem:[#allocation3 + $0x48] sm:$0xff]  ;;  %v352_v52 = vld [vmem:[%s1087_s8] sm:$0xff]  ;;  %v349_v31 = vlaneseq }
  0x31   : > { %386 = vmatpush.msra.mxu0 %v369_v21  ;;  %493 = vmatpush.msra.mxu3 %v432_v41  ;;  %v410_v53 = vld [vmem:[#allocation3 + $0x50] sm:$0xff]  ;;  %v553_v54 = vld [vmem:[#allocation5 + $0x168] sm:$0xff]  ;;  %v407_v56 = vld [vmem:[#allocation3 + $0x38] sm:$0xff] }
  0x32   : > { %475 = vmatpush.msra.mxu2 %v425_v32  ;;  %456 = vmatpush.msra.mxu1 %v421_v35  ;;  %v406_v55 = vld [vmem:[#allocation3 + $0x30] sm:$0xff]  ;;  %v423_v57 = vld [vmem:[#allocation3 + $0xb8] sm:$0xff]  ;;  %v404_v60 = vld [vmem:[#allocation3 + $0x20] sm:$0xff] }
  0x33   : > { %387 = vmatpush.msra.mxu0 %v368_v26  ;;  %494 = vmatpush.msra.mxu3 %v429_v45  ;;  %v550_v58 = vld [vmem:[#allocation5 + $0x150] sm:$0xff]  ;;  %v403_v59 = vld [vmem:[#allocation3 + $0x18] sm:$0xff]  ;;  %v420_v61 = vld [vmem:[#allocation3 + $0xa0] sm:$0xff] }
  0x34   : > { %476 = vmatpush.msra.mxu2 %v422_v36  ;;  %457 = vmatpush.msra.mxu1 %v418_v39  ;;  %v547_v62 = vld [vmem:[#allocation5 + $0x138] sm:$0xff]  ;;  %v400_v63 = vld [vmem:[#allocation3] sm:$0xff]  ;;  %v401_v0 = vld [vmem:[#allocation3 + $0x8] sm:$0xff]  ;;  %v1151_v39 = vand.u32 127, %v349_v31 }
  0x35   : > { %388 = vmatpush.msra.mxu0 %v367_v30  ;;  %495 = vmatpush.msra.mxu3 %v426_v49  ;;  %v554_v1 = vld [vmem:[#allocation5 + $0x170] sm:$0xff]  ;;  %v544_v2 = vld [vmem:[#allocation5 + $0x120] sm:$0xff]  ;;  %v555_v3 = vld [vmem:[#allocation5 + $0x178] sm:$0xff] }
  0x36   : > { %477 = vmatpush.msra.mxu2 %v419_v40  ;;  %458 = vmatpush.msra.mxu1 %v415_v43  ;;  %v551_v4 = vld [vmem:[#allocation5 + $0x158] sm:$0xff]  ;;  %v417_v5 = vld [vmem:[#allocation3 + $0x88] sm:$0xff]  ;;  %v552_v7 = vld [vmem:[#allocation5 + $0x160] sm:$0xff]  ;;  %vm351_vm0 = vcmp.eq.s32.totalorder %v1151_v39, 32 }
  0x37   : > { %389 = vmatpush.msra.mxu0 %v366_v34  ;;  %496 = vmatpush.msra.mxu3 %v423_v57  ;;  %v541_v6 = vld [vmem:[#allocation5 + $0x108] sm:$0xff]  ;;  %v548_v8 = vld [vmem:[#allocation5 + $0x140] sm:$0xff]  ;;  %v538_v9 = vld [vmem:[#allocation5 + $0xf0] sm:$0xff] }
  0x38   : > { %478 = vmatpush.msra.mxu2 %v416_v44  ;;  %459 = vmatpush.msra.mxu1 %v412_v47  ;;  %v549_v10 = vld [vmem:[#allocation5 + $0x148] sm:$0xff]  ;;  %v535_v12 = vld [vmem:[#allocation5 + $0xd8] sm:$0xff]  ;;  %v546_v13 = vld [vmem:[#allocation5 + $0x130] sm:$0xff] }
  0x39   : > { %390 = vmatpush.msra.mxu0 %v365_v38  ;;  %497 = vmatpush.msra.mxu3 %v420_v61  ;;  %v545_v11 = vld [vmem:[#allocation5 + $0x128] sm:$0xff]  ;;  %v542_v14 = vld [vmem:[#allocation5 + $0x110] sm:$0xff]  ;;  %v532_v15 = vld [vmem:[#allocation5 + $0xc0] sm:$0xff] }
  0x3a   : > { %479 = vmatpush.msra.mxu2 %v413_v48  ;;  %460 = vmatpush.msra.mxu1 %v409_v51  ;;  %v543_v16 = vld [vmem:[#allocation5 + $0x118] sm:$0xff]  ;;  %v529_v18 = vld [vmem:[#allocation5 + $0xa8] sm:$0xff]  ;;  %v540_v19 = vld [vmem:[#allocation5 + $0x100] sm:$0xff] }
  0x3b   : > { %391 = vmatpush.msra.mxu0 %v364_v42  ;;  %498 = vmatpush.msra.mxu3 %v417_v5  ;;  %v539_v17 = vld [vmem:[#allocation5 + $0xf8] sm:$0xff]  ;;  %v536_v20 = vld [vmem:[#allocation5 + $0xe0] sm:$0xff]  ;;  %v526_v21 = vld [vmem:[#allocation5 + $0x90] sm:$0xff] }
  0x3c   : > { %480 = vmatpush.msra.mxu2 %v410_v53  ;;  %461 = vmatpush.msra.mxu1 %v406_v55  ;;  %v537_v22 = vld [vmem:[#allocation5 + $0xe8] sm:$0xff]  ;;  %v523_v23 = vld [vmem:[#allocation5 + $0x78] sm:$0xff]  ;;  %v414_v24 = vld [vmem:[#allocation3 + $0x70] sm:$0xff] }
  0x3d   : > { %392 = vmatpush.msra.mxu0 %v363_v46  ;;  %v520_v25 = vld [vmem:[#allocation5 + $0x60] sm:$0xff]  ;;  %v533_v26 = vld [vmem:[#allocation5 + $0xc8] sm:$0xff]  ;;  %499 = vmatpush.msra.mxu3 %v414_v24  ;;  %v534_v27 = vld [vmem:[#allocation5 + $0xd0] sm:$0xff] }
  0x3e   : > { %481 = vmatpush.msra.mxu2 %v407_v56  ;;  %462 = vmatpush.msra.mxu1 %v403_v59  ;;  %v411_v28 = vld [vmem:[#allocation3 + $0x58] sm:$0xff]  ;;  %v517_v29 = vld [vmem:[#allocation5 + $0x48] sm:$0xff]  ;;  %v530_v30 = vld [vmem:[#allocation5 + $0xb0] sm:$0xff] }
  0x3f   : > { %393 = vmatpush.msra.mxu0 %v362_v50  ;;  %500 = vmatpush.msra.mxu3 %v411_v28  ;;  %v531_v32 = vld [vmem:[#allocation5 + $0xb8] sm:$0xff]  ;;  %v408_v33 = vld [vmem:[#allocation3 + $0x40] sm:$0xff]  ;;  %v514_v34 = vld [vmem:[#allocation5 + $0x30] sm:$0xff] }
  0x40   : > { %394 = vmatmul.f32.vlgmr.msra.gmra.mxu0 %v352_v52  ;;  %482 = vmatpush.msra.mxu2 %v404_v60  ;;  %v527_v36 = vld [vmem:[#allocation5 + $0x98] sm:$0xff]  ;;  %v528_v37 = vld [vmem:[#allocation5 + $0xa0] sm:$0xff]  ;;  %v405_v40 = vld [vmem:[#allocation3 + $0x28] sm:$0xff] }
  0x41   : > { %556 = vmatpush.msrb.mxu0 %v553_v54  ;;  %463 = vmatpush.msra.mxu1 %v400_v63  ;;  %v354_v38 = vld [vmem:[#allocation2] sm:$0xff]  ;;  %v524_v42 = vld [vmem:[#allocation5 + $0x80] sm:$0xff]  ;;  %v525_v44 = vld [vmem:[#allocation5 + $0x88] sm:$0xff] }
  0x42   : > { %483 = vmatpush.msra.mxu2 %v401_v0  ;;  %501 = vmatpush.msra.mxu3 %v408_v33  ;;  %v511_v41 = vld [vmem:[#allocation5 + $0x18] sm:$0xff]  ;;  %v402_v45 = vld [vmem:[#allocation3 + $0x10] sm:$0xff]  ;;  %v508_v46 = vld [vmem:[#allocation5] sm:$0xff] }
  0x43   : > { %557 = vmatpush.msrb.mxu0 %v550_v58  ;;  %576 = vmatpush.msrb.mxu1 %v554_v1  ;;  %v521_v47 = vld [vmem:[#allocation5 + $0x68] sm:$0xff]  ;;  %v522_v48 = vld [vmem:[#allocation5 + $0x70] sm:$0xff]  ;;  %v519_v51 = vld [vmem:[#allocation5 + $0x58] sm:$0xff] }
  0x44   : > { %596 = vmatpush.msrb.mxu2 %v555_v3  ;;  %502 = vmatpush.msra.mxu3 %v405_v40  ;;  %v518_v50 = vld [vmem:[#allocation5 + $0x50] sm:$0xff]  ;;  %v515_v52 = vld [vmem:[#allocation5 + $0x38] sm:$0xff]  ;;  %v516_v53 = vld [vmem:[#allocation5 + $0x40] sm:$0xff] }
  0x45   : > { %558 = vmatpush.msrb.mxu0 %v547_v62  ;;  %577 = vmatpush.msrb.mxu1 %v551_v4  ;;  %v512_v54 = vld [vmem:[#allocation5 + $0x20] sm:$0xff]  ;;  %v513_v55 = vld [vmem:[#allocation5 + $0x28] sm:$0xff]  ;;  %v510_v57 = vld [vmem:[#allocation5 + $0x10] sm:$0xff] }
  0x46   : > { %597 = vmatpush.msrb.mxu2 %v552_v7  ;;  %503 = vmatpush.msra.mxu3 %v402_v45  ;;  %v509_v56 = vld [vmem:[#allocation5 + $0x8] sm:$0xff]  ;;  %v679_v61 = vld [vmem:[#allocation7 + $0x78] sm:$0xff]  ;;  %v678_v62 = vld [vmem:[#allocation7 + $0x70] sm:$0xff] }
  0x47   : > { %559 = vmatpush.msrb.mxu0 %v544_v2  ;;  %578 = vmatpush.msrb.mxu1 %v548_v8  ;;  %v677_v63 = vld [vmem:[#allocation7 + $0x68] sm:$0xff]  ;;  %v676_v0 = vld [vmem:[#allocation7 + $0x60] sm:$0xff]  ;;  %v675_v1 = vld [vmem:[#allocation7 + $0x58] sm:$0xff] }
  0x48   : > { %598 = vmatpush.msrb.mxu2 %v549_v10  ;;  %680 = vmatpush.msrb.mxu3 %v679_v61  ;;  %v674_v2 = vld [vmem:[#allocation7 + $0x50] sm:$0xff]  ;;  %v673_v3 = vld [vmem:[#allocation7 + $0x48] sm:$0xff]  ;;  %v672_v5 = vld [vmem:[#allocation7 + $0x40] sm:$0xff] }
  0x49   : > { %560 = vmatpush.msrb.mxu0 %v541_v6  ;;  %579 = vmatpush.msrb.mxu1 %v545_v11  ;;  %v671_v7 = vld [vmem:[#allocation7 + $0x38] sm:$0xff]  ;;  %v669_v11 = vld [vmem:[#allocation7 + $0x28] sm:$0xff] }
  0x4a   : > { %599 = vmatpush.msrb.mxu2 %v546_v13  ;;  %681 = vmatpush.msrb.mxu3 %v678_v62  ;;  %v667_v13 = vld [vmem:[#allocation7 + $0x18] sm:$0xff] }
  0x4b   : > { %561 = vmatpush.msrb.mxu0 %v538_v9  ;;  %580 = vmatpush.msrb.mxu1 %v542_v14  ;;  %v670_v9 = vld [vmem:[#allocation7 + $0x30] sm:$0xff] }
  0x4c   : > { %600 = vmatpush.msrb.mxu2 %v543_v16  ;;  %682 = vmatpush.msrb.mxu3 %v677_v63  ;;  %v666_v16 = vld [vmem:[#allocation7 + $0x10] sm:$0xff] }
  0x4d   : > { %562 = vmatpush.msrb.mxu0 %v535_v12  ;;  %581 = vmatpush.msrb.mxu1 %v539_v17  ;;  %v668_v12 = vld [vmem:[#allocation7 + $0x20] sm:$0xff] }
  0x4e   : > { %601 = vmatpush.msrb.mxu2 %v540_v19  ;;  %683 = vmatpush.msrb.mxu3 %v676_v0 }
  0x4f   : > { %563 = vmatpush.msrb.mxu0 %v532_v15  ;;  %582 = vmatpush.msrb.mxu1 %v536_v20 }
  0x50   : > { %602 = vmatpush.msrb.mxu2 %v537_v22  ;;  %684 = vmatpush.msrb.mxu3 %v675_v1  ;;  %v664_v22 = vld [vmem:[#allocation7] sm:$0xff] }
  0x51   : > { %564 = vmatpush.msrb.mxu0 %v529_v18  ;;  %583 = vmatpush.msrb.mxu1 %v533_v26  ;;  %v665_v18 = vld [vmem:[#allocation7 + $0x8] sm:$0xff] }
  0x52   : > { %603 = vmatpush.msrb.mxu2 %v534_v27  ;;  %685 = vmatpush.msrb.mxu3 %v674_v2 }
  0x53   : > { %565 = vmatpush.msrb.mxu0 %v526_v21  ;;  %584 = vmatpush.msrb.mxu1 %v530_v30 }
  0x54   : > { %604 = vmatpush.msrb.mxu2 %v531_v32  ;;  %686 = vmatpush.msrb.mxu3 %v673_v3 }
  0x55   : > { %566 = vmatpush.msrb.mxu0 %v523_v23  ;;  %585 = vmatpush.msrb.mxu1 %v527_v36 }
  0x56   : > { %605 = vmatpush.msrb.mxu2 %v528_v37  ;;  %687 = vmatpush.msrb.mxu3 %v672_v5 }
  0x57   : > { %567 = vmatpush.msrb.mxu0 %v520_v25  ;;  %586 = vmatpush.msrb.mxu1 %v524_v42 }
  0x58   : > { %606 = vmatpush.msrb.mxu2 %v525_v44  ;;  %688 = vmatpush.msrb.mxu3 %v671_v7 }
  0x59   : > { %568 = vmatpush.msrb.mxu0 %v517_v29  ;;  %587 = vmatpush.msrb.mxu1 %v521_v47 }
  0x5a   : > { %607 = vmatpush.msrb.mxu2 %v522_v48  ;;  %689 = vmatpush.msrb.mxu3 %v670_v9 }
  0x5b   : > { %569 = vmatpush.msrb.mxu0 %v514_v34  ;;  %588 = vmatpush.msrb.mxu1 %v518_v50 }
  0x5c   : > { %608 = vmatpush.msrb.mxu2 %v519_v51  ;;  %690 = vmatpush.msrb.mxu3 %v669_v11 }
  0x5d   : > { %570 = vmatpush.msrb.mxu0 %v511_v41  ;;  %589 = vmatpush.msrb.mxu1 %v515_v52 }
  0x5e   : > { %609 = vmatpush.msrb.mxu2 %v516_v53  ;;  %691 = vmatpush.msrb.mxu3 %v668_v12 }
  0x5f   : > { %571 = vmatpush.msrb.mxu0 %v508_v46  ;;  %590 = vmatpush.msrb.mxu1 %v512_v54 }
  0x60   : > { %610 = vmatpush.msrb.mxu2 %v513_v55  ;;  %692 = vmatpush.msrb.mxu3 %v667_v13 }
  0x61   : > { %591 = vmatpush.msrb.mxu1 %v509_v56 }
  0x62   : > { %611 = vmatpush.msrb.mxu2 %v510_v57  ;;  %693 = vmatpush.msrb.mxu3 %v666_v16 }
  0x64   : > { %694 = vmatpush.msrb.mxu3 %v665_v18 }
  0x66   : > { %695 = vmatpush.msrb.mxu3 %v664_v22 }
  0x95   : > { %v358_v35 = vpop.permute.xlu0 %357 }
  0x96   : > { %v1153_v43 = vmul.f32 %v358_v35, %v354_v38 }
  0x98   : > { %v361_v49 = vsel %vm351_vm0, 1.0, %v1153_v43 }
  0x99   : > { %572 = vmatmul.f32.vlgmr.msrb.gmra.mxu0 %v361_v49 }
  0xbd   : > { %v395_v58 = vpop.f32.mrf.mxu0 }
  0xbe   : > { %867 = vtanh.f32 %v395_v58 }
  0xc4   : > { %v868_v59 = vpop.eup %867 }
  0xc5   : > { %v399_v60 = vsel %vm351_vm0, 1.0, %v868_v59 }
  0xc6   : > { %464 = vmatmul.f32.vlgmr.msra.gmra.mxu1 %v399_v60  ;;  %484 = vmatmul.f32.vlgmr.msra.gmra.mxu2 %v399_v60 }
  0xc7   : > { %504 = vmatmul.f32.vlgmr.msra.gmra.mxu3 %v399_v60 }
  0xce   : > { %592 = vmatmul.f32.vlgmr.msrb.gmra.mxu1 %v361_v49  ;;  %612 = vmatmul.f32.vlgmr.msrb.gmra.mxu2 %v361_v49 }
 0x116   : > { %v573_v4 = vpop.f32.mrf.mxu0 }
 0x143   : > { %v465_v6 = vpop.f32.mrf.mxu1 }
 0x144   : > { %v616_v8 = vadd.f32 %v573_v4, %v465_v6 }
 0x146   : > { %v817_v10 = vmul.f32 -1.442695, %v616_v8 }
 0x148   : > { %869 = vpow2.f32 %v817_v10 }
 0x149   : > { %v485_v14 = vpop.f32.mrf.mxu2 }
 0x14a   : > { %v505_v41 = vpop.f32.mrf.mxu3 }
 0x14b   : > { %v593_v15 = vpop.f32.mrf.mxu1 }
 0x14c   : > { %v636_v17 = vadd.f32 %v593_v15, %v485_v14 }
 0x14e   : > { %v870_v19 = vpop.eup %869  ;;  %v818_v20 = vmul.f32 -1.442695, %v636_v17 }
 0x14f   : > { %v620_v21 = vadd.f32 1.0, %v870_v19 }
 0x150   : > { %871 = vpow2.f32 %v818_v20 }
 0x151   : > { %873 = vrcp.f32 %v620_v21  ;;  %v632_v28 = vand.u32 2147483648, %v620_v21  ;;  %v630_v30 = vand.u32 2147483647, %v620_v21  ;;  %vm626_vm2 = vweird.f32 %v620_v21  ;;  %v613_v36 = vpop.f32.mrf.mxu2 }
 0x153   : > { %v633_v33 = vor.u32 1.1754944e-38, %v632_v28  ;;  %vm631_vm4 = vcmp.eq.f32.partialorder %v630_v30, 8.507059e+37 }
 0x156   : > { %v872_v23 = vpop.eup %871 }
 0x157   : > { %v874_v24 = vpop.eup %873  ;;  %v640_v25 = vadd.f32 1.0, %v872_v23 }
 0x158   : > { %v622_v26 = vmul.f32 %v874_v24, %v620_v21  ;;  %vm627_vm1 = vweird.f32 %v874_v24 }
 0x159   : > { %875 = vrcp.f32 %v640_v25  ;;  %vm628_vm3 = vmor %vm626_vm2, %vm627_vm1  ;;  %v652_v42 = vand.u32 2147483648, %v640_v25  ;;  %v650_v46 = vand.u32 2147483647, %v640_v25  ;;  %vm646_vm6 = vweird.f32 %v640_v25 }
 0x15a   : > { %v623_v27 = vsub.f32 1.0, %v622_v26 }
 0x15b   : > { %v653_v48 = vor.u32 1.1754944e-38, %v652_v42  ;;  %vm651_vm8 = vcmp.eq.f32.partialorder %v650_v46, 8.507059e+37 }
 0x15c   : > { %v624_v29 = vmul.f32 %v874_v24, %v623_v27 }
 0x15e   : > { %v625_v31 = vadd.f32 %v874_v24, %v624_v29 }
 0x15f   : > { %v876_v32 = vpop.eup %875 }
 0x160   : > { %v642_v34 = vmul.f32 %v876_v32, %v640_v25  ;;  %v629_v35 = vsel %vm628_vm3, %v874_v24, %v625_v31  ;;  %vm647_vm5 = vweird.f32 %v876_v32 }
 0x161   : > { %v634_v37 = vsel %vm631_vm4, %v633_v33, %v629_v35  ;;  %vm648_vm7 = vmor %vm646_vm6, %vm647_vm5 }
 0x162   : > { %v643_v38 = vsub.f32 1.0, %v642_v34  ;;  %v656_v40 = vmul.f32 %v634_v37, %v613_v36 }
 0x164   : > { %v657_v44 = vadd.f32 %v656_v40, %v505_v41  ;;  %v644_v45 = vmul.f32 %v876_v32, %v643_v38 }
 0x166   : > { %877 = vtanh.f32 %v657_v44  ;;  %v645_v47 = vadd.f32 %v876_v32, %v644_v45 }
 0x168   : > { %v649_v49 = vsel %vm648_vm7, %v876_v32, %v645_v47 }
 0x169   : > { %v654_v50 = vsel %vm651_vm8, %v653_v48, %v649_v49 }
 0x16a   : > { %v659_v51 = vsub.f32 1.0, %v654_v50  ;;  %v661_v54 = vmul.f32 %v654_v50, %v1153_v43 }
 0x16c   : > { %v878_v52 = vpop.eup %877 }
 0x16d   : > { %v660_v53 = vmul.f32 %v878_v52, %v659_v51 }
 0x16f   : > { %v662_v55 = vadd.f32 %v661_v54, %v660_v53 }
 0x171   : > { %v663_v56 = vsel %vm351_vm0, 1.0, %v662_v55  ;;  %700 = vst [vmem:[#allocation2] sm:$0xff] %v662_v55 }
 0x172   : > { %696 = vmatmul.f32.vlgmr.msrb.gmra.mxu3 %v663_v56  ;;  %701 = vst [vmem:[%s1095_s14] sm:$0xff] %v662_v55 }
 0x1f5   : > { %v697_v57 = vpop.f32.mrf.mxu3 }
 0x1f6   : > { %702 = vst [vmem:[%s1095_s14 + $0x8] sm:$0xff] %v697_v57 }
 0x1f7 PF: > { %s19_s24 = sadd.s32 1, %s983_s24  }
 0x1f8   : > { %p16_p8 = scmp.ge.s32.totalorder %s19_s24, 10  }
 0x1fa   :  { %18 = sbr.rel (!%p16_p8) target bundleno = 2 (0x2), region = 98 }
 0x1ff   :  { %724 = vsyncpa [#allocation4], 1 }
 0x200   :  { %726 = vsyncpa [#allocation4 + $0x1], 1 }
 0x201   :  { %727 = vsyncpa [#allocation6], 1 }

</bundles_post_ra>
